<compile_context>
chip_gen: v7x
topology: tpu7x:2x2x1
jax: 0.10.0
libtpu: 0.0.40
codegen_flags: <defaults>
</compile_context>

<pallas_src>
import jax
import jax.numpy as jnp
from jax.experimental import pallas as pl
from jax.experimental.pallas import tpu as pltpu

SLOPE_LEAKY_RELU = 0.01
LANE = 128


def _round_up(n, m):
    return (n + m - 1) // m * m


def _cdiv(a, b):
    return -(-a // b)


def generator_kernel(x_ref, w1_ref, b1_ref, w2_ref, b2_ref, w3_ref, b3_ref, o_ref):
    # fc1: bf16 MXU, f32 accumulate; bias + leaky_relu in f32 (VPU).
    x = x_ref[...].astype(jnp.bfloat16)
    h = jnp.dot(x, w1_ref[...], preferred_element_type=jnp.float32)
    h = h + b1_ref[...]                                   # (TB, H) + (1, H)
    h = jnp.where(h >= 0, h, SLOPE_LEAKY_RELU * h)

    # fc2 + sigmoid via tanh: single EUP transcendental; mul/add ride the VALU.
    h = jnp.dot(h.astype(jnp.bfloat16), w2_ref[...],
                preferred_element_type=jnp.float32)
    h = h + b2_ref[...]
    h = 0.5 * jnp.tanh(0.5 * h) + 0.5

    # fc3 (no activation).
    out = jnp.dot(h.astype(jnp.bfloat16), w3_ref[...],
                  preferred_element_type=jnp.float32)
    out = out + b3_ref[...]
    o_ref[...] = out.astype(o_ref.dtype)


def _vmem_budgets():
    """(tile-selection budget, scoped vmem limit, max batch tile) per generation."""
    cap = 64 * 1024 * 1024
    try:
        cap = getattr(pltpu.get_tpu_info(), "vmem_capacity_bytes", cap)
    except Exception:
        pass
    if cap <= 64 * 1024 * 1024:            # v7x: 64 MiB per TensorCore
        return 40 << 20, 48 << 20, 512
    return 96 << 20, 110 << 20, 2048        # v5e / v6e: 128 MiB


def _vmem_estimate(tb, d_in, h_pad, o_pad):
    # Resident, single-buffered (pl.Buffered(1)) bf16 weights + f32 biases.
    weights = (d_in * h_pad + h_pad * h_pad + h_pad * o_pad) * 2
    biases = (2 * h_pad + o_pad) * 4
    # Double-buffered batch-tiled streams: x (f32, real width) + out (f32, padded).
    io = 2 * (tb * d_in * 4 + tb * o_pad * 4)
    # In-kernel f32 temporaries.
    interm = 3 * tb * h_pad * 4
    return weights + biases + io + interm


def _choose_tb(B, d_in, h_pad, o_pad, budget, tb_max):
    tb = min(tb_max, _round_up(B, 8))
    while tb > 8 and _vmem_estimate(tb, d_in, h_pad, o_pad) > budget:
        tb = max(8, _round_up(tb // 2, 8))
    # v7x megacore: prefer an even, multi-step grid for large batches so the
    # two TensorCores split the "parallel" batch axis evenly. Adjustments only
    # ever shrink tb, so the VMEM estimate above remains valid.
    steps = _cdiv(B, tb)
    if steps == 1 and B >= 256:
        tb = max(8, _round_up(_cdiv(B, 2), 8))
        steps = _cdiv(B, tb)
    if steps > 1 and steps % 2 == 1:
        tb = max(8, _round_up(_cdiv(B, steps + 1), 8))
    return tb


def generator_forward(x, params):
    """x: (B, dim_input) float32. params: (in,out) weights, (1,out) biases (f32)."""
    w1, b1, w2, b2, w3, b3 = (params[k] for k in ("w1", "b1", "w2", "b2", "w3", "b3"))
    B, d_in = x.shape
    hidden = w1.shape[1]
    out_size = w3.shape[1]

    # Lane-dense padding only for hidden / output features (NOT for d_in).
    h_pad = _round_up(hidden, LANE)
    o_pad = _round_up(out_size, LANE)

    budget, vmem_limit, tb_max = _vmem_budgets()
    # TODO(synk): for hidden sizes whose resident weights alone exceed the VMEM
    # budget (v7x), add a K-split "arbitrary" grid axis with a VMEM f32
    # accumulator (pl.when init/finalize) instead of shrinking tb below ~128.
    tb = _choose_tb(B, d_in, h_pad, o_pad, budget, tb_max)
    b_pad = _round_up(B, tb)

    bf16, f32 = jnp.bfloat16, jnp.float32
    # x keeps its real feature width; only batch rows may be zero-padded.
    x_p = x if b_pad == B else jnp.zeros((b_pad, d_in), f32).at[:B].set(x)
    # Weights: bf16, feature dims padded to lane-dense widths; biases stay f32.
    w1_p = jnp.zeros((d_in, h_pad), bf16).at[:, :hidden].set(w1.astype(bf16))
    w2_p = jnp.zeros((h_pad, h_pad), bf16).at[:hidden, :hidden].set(w2.astype(bf16))
    w3_p = jnp.zeros((h_pad, o_pad), bf16).at[:hidden, :out_size].set(w3.astype(bf16))
    b1_p = jnp.zeros((1, h_pad), f32).at[:, :hidden].set(b1)
    b2_p = jnp.zeros((1, h_pad), f32).at[:, :hidden].set(b2)
    b3_p = jnp.zeros((1, o_pad), f32).at[:, :out_size].set(b3)

    grid = (b_pad // tb,)
    tiled = lambda i: (i, 0)          # x / out: tile over batch
    resident = lambda i: (0, 0)       # weights / biases: same block every step
    single = pl.Buffered(1)           # resident operands: no double-buffering

    out_padded = pl.pallas_call(
        generator_kernel,
        out_shape=jax.ShapeDtypeStruct((b_pad, o_pad), f32),
        grid=grid,
        in_specs=[
            pl.BlockSpec((tb, d_in), tiled),                               # x (real width)
            pl.BlockSpec((d_in, h_pad), resident, pipeline_mode=single),   # w1
            pl.BlockSpec((1, h_pad), resident, pipeline_mode=single),      # b1
            pl.BlockSpec((h_pad, h_pad), resident, pipeline_mode=single),  # w2
            pl.BlockSpec((1, h_pad), resident, pipeline_mode=single),      # b2
            pl.BlockSpec((h_pad, o_pad), resident, pipeline_mode=single),  # w3
            pl.BlockSpec((1, o_pad), resident, pipeline_mode=single),      # b3
        ],
        out_specs=pl.BlockSpec((tb, o_pad), tiled),
        compiler_params=pltpu.CompilerParams(
            dimension_semantics=("parallel",),
            vmem_limit_bytes=vmem_limit,
        ),
    )(x_p, w1_p, b1_p, w2_p, b2_p, w3_p, b3_p)

    return out_padded[:B, :out_size]


def init_params(key, dim_input, hidden_size, output_size):
    """Deterministic synthetic init (uniform, like PyTorch's default Linear init)."""
    keys = jax.random.split(key, 6)

    def linear(kw, kb, fan_in, fan_out):
        bound = 1.0 / jnp.sqrt(fan_in)
        w = jax.random.uniform(kw, (fan_in, fan_out), jnp.float32, -bound, bound)
        b = jax.random.uniform(kb, (1, fan_out), jnp.float32, -bound, bound)
        return w, b

    w1, b1 = linear(keys[0], keys[1], dim_input, hidden_size)
    w2, b2 = linear(keys[2], keys[3], hidden_size, hidden_size)
    w3, b3 = linear(keys[4], keys[5], hidden_size, output_size)
    return {"w1": w1, "b1": b1, "w2": w2, "b2": b2, "w3": w3, "b3": b3}


def reference_forward(x, params):
    """Mirrors the kernel's numerics: bf16 matmul inputs, f32 accumulate/activations."""
    bf16 = jnp.bfloat16
    h = jnp.dot(x.astype(bf16), params["w1"].astype(bf16),
                preferred_element_type=jnp.float32) + params["b1"]
    h = jnp.where(h >= 0, h, SLOPE_LEAKY_RELU * h)
    h = jnp.dot(h.astype(bf16), params["w2"].astype(bf16),
                preferred_element_type=jnp.float32) + params["b2"]
    h = jax.nn.sigmoid(h)
    return jnp.dot(h.astype(bf16), params["w3"].astype(bf16),
                   preferred_element_type=jnp.float32) + params["b3"]


if __name__ == "__main__":
    # Small shapes consistent with the module (Linear -> Linear -> Linear).
    batch, dim_input, hidden_size, output_size = 8, 16, 32, 8

    key = jax.random.PRNGKey(0)
    k_x, k_p = jax.random.split(key)
    x = jax.random.normal(k_x, (batch, dim_input), dtype=jnp.float32)
    params = init_params(k_p, dim_input, hidden_size, output_size)

    out = generator_forward(x, params)
    out = jax.block_until_ready(out)

    ref = reference_forward(x, params)
    assert out.shape == (batch, output_size)
    # bf16 matmul inputs dominate the error; the tanh-based sigmoid is exact.
    assert jnp.allclose(out, ref, atol=1e-2, rtol=1e-2), "mismatch vs JAX reference"

    print("KERNEL_OK")
</pallas_src>

<mosaic_0001>
module attributes {stable_mosaic.version = 11 : i64} {
  func.func @generator_kernel(%arg0: i32, %arg1: memref<8x16xf32, #tpu.memory_space<vmem>>, %arg2: memref<16x128xbf16, #tpu.memory_space<vmem>>, %arg3: memref<1x128xf32, #tpu.memory_space<vmem>>, %arg4: memref<128x128xbf16, #tpu.memory_space<vmem>>, %arg5: memref<1x128xf32, #tpu.memory_space<vmem>>, %arg6: memref<128x128xbf16, #tpu.memory_space<vmem>>, %arg7: memref<1x128xf32, #tpu.memory_space<vmem>>, %arg8: memref<8x128xf32, #tpu.memory_space<vmem>>) attributes {dimension_semantics = [#tpu.dimension_semantics<parallel>], iteration_bounds = array<i64: 1>, scalar_prefetch = 0 : i64, scratch_operands = 0 : i64, tpu.core_type = #tpu.core_type<tc>, window_params = [{transform_indices = @transform_0, window_bounds = array<i64: 8, 16>}, {pipeline_mode = #tpu.pipeline_mode<synchronous>, transform_indices = @transform_1, window_bounds = array<i64: 16, 128>}, {pipeline_mode = #tpu.pipeline_mode<synchronous>, transform_indices = @transform_2, window_bounds = array<i64: 1, 128>}, {pipeline_mode = #tpu.pipeline_mode<synchronous>, transform_indices = @transform_3, window_bounds = array<i64: 128, 128>}, {pipeline_mode = #tpu.pipeline_mode<synchronous>, transform_indices = @transform_4, window_bounds = array<i64: 1, 128>}, {pipeline_mode = #tpu.pipeline_mode<synchronous>, transform_indices = @transform_5, window_bounds = array<i64: 128, 128>}, {pipeline_mode = #tpu.pipeline_mode<synchronous>, transform_indices = @transform_6, window_bounds = array<i64: 1, 128>}, {transform_indices = @transform_7, window_bounds = array<i64: 8, 128>}]} {
    %c0 = arith.constant 0 : index
    %c0_0 = arith.constant 0 : index
    %0 = vector.load %arg1[%c0, %c0_0] : memref<8x16xf32, #tpu.memory_space<vmem>>, vector<8x16xf32>
    %1 = arith.truncf %0 : vector<8x16xf32> to vector<8x16xbf16>
    %c0_1 = arith.constant 0 : index
    %c0_2 = arith.constant 0 : index
    %2 = vector.load %arg2[%c0_1, %c0_2] : memref<16x128xbf16, #tpu.memory_space<vmem>>, vector<16x128xbf16>
    %cst = arith.constant dense<0.000000e+00> : vector<8x128xf32>
    %3 = tpu.matmul %1, %2, %cst {dimension_numbers = #tpu.dot_dimension_numbers<[1], [0], [0], [1], [0, 0, 1, 1], [], []>} : vector<8x16xbf16>, vector<16x128xbf16>, vector<8x128xf32> -> vector<8x128xf32>
    %c0_3 = arith.constant 0 : index
    %c0_4 = arith.constant 0 : index
    %4 = vector.load %arg3[%c0_3, %c0_4] : memref<1x128xf32, #tpu.memory_space<vmem>>, vector<1x128xf32>
    %5 = vector.broadcast %4 : vector<1x128xf32> to vector<8x128xf32>
    %6 = arith.addf %3, %5 : vector<8x128xf32>
    %cst_5 = arith.constant 0.000000e+00 : f32
    %7 = vector.broadcast %cst_5 : f32 to vector<8x128xf32>
    %8 = arith.cmpf oge, %6, %7 : vector<8x128xf32>
    %cst_6 = arith.constant 0.00999999977 : f32
    %9 = vector.broadcast %cst_6 : f32 to vector<8x128xf32>
    %10 = arith.mulf %9, %6 : vector<8x128xf32>
    %11 = arith.select %8, %6, %10 : vector<8x128xi1>, vector<8x128xf32>
    %12 = arith.truncf %11 : vector<8x128xf32> to vector<8x128xbf16>
    %c0_7 = arith.constant 0 : index
    %c0_8 = arith.constant 0 : index
    %13 = vector.load %arg4[%c0_7, %c0_8] : memref<128x128xbf16, #tpu.memory_space<vmem>>, vector<128x128xbf16>
    %cst_9 = arith.constant dense<0.000000e+00> : vector<8x128xf32>
    %14 = tpu.matmul %12, %13, %cst_9 {dimension_numbers = #tpu.dot_dimension_numbers<[1], [0], [0], [1], [0, 0, 1, 1], [], []>} : vector<8x128xbf16>, vector<128x128xbf16>, vector<8x128xf32> -> vector<8x128xf32>
    %c0_10 = arith.constant 0 : index
    %c0_11 = arith.constant 0 : index
    %15 = vector.load %arg5[%c0_10, %c0_11] : memref<1x128xf32, #tpu.memory_space<vmem>>, vector<1x128xf32>
    %16 = vector.broadcast %15 : vector<1x128xf32> to vector<8x128xf32>
    %17 = arith.addf %14, %16 : vector<8x128xf32>
    %cst_12 = arith.constant 5.000000e-01 : f32
    %18 = vector.broadcast %cst_12 : f32 to vector<8x128xf32>
    %19 = arith.mulf %18, %17 : vector<8x128xf32>
    %20 = math.tanh %19 : vector<8x128xf32>
    %cst_13 = arith.constant 5.000000e-01 : f32
    %21 = vector.broadcast %cst_13 : f32 to vector<8x128xf32>
    %22 = arith.mulf %21, %20 : vector<8x128xf32>
    %cst_14 = arith.constant 5.000000e-01 : f32
    %23 = vector.broadcast %cst_14 : f32 to vector<8x128xf32>
    %24 = arith.addf %22, %23 : vector<8x128xf32>
    %25 = arith.truncf %24 : vector<8x128xf32> to vector<8x128xbf16>
    %c0_15 = arith.constant 0 : index
    %c0_16 = arith.constant 0 : index
    %26 = vector.load %arg6[%c0_15, %c0_16] : memref<128x128xbf16, #tpu.memory_space<vmem>>, vector<128x128xbf16>
    %cst_17 = arith.constant dense<0.000000e+00> : vector<8x128xf32>
    %27 = tpu.matmul %25, %26, %cst_17 {dimension_numbers = #tpu.dot_dimension_numbers<[1], [0], [0], [1], [0, 0, 1, 1], [], []>} : vector<8x128xbf16>, vector<128x128xbf16>, vector<8x128xf32> -> vector<8x128xf32>
    %c0_18 = arith.constant 0 : index
    %c0_19 = arith.constant 0 : index
    %28 = vector.load %arg7[%c0_18, %c0_19] : memref<1x128xf32, #tpu.memory_space<vmem>>, vector<1x128xf32>
    %29 = vector.broadcast %28 : vector<1x128xf32> to vector<8x128xf32>
    %30 = arith.addf %27, %29 : vector<8x128xf32>
    %c0_20 = arith.constant 0 : index
    %c0_21 = arith.constant 0 : index
    %31 = vector.load %arg8[%c0_20, %c0_21] : memref<8x128xf32, #tpu.memory_space<vmem>>, vector<8x128xf32>
    tpu.vector_store %arg8[%c0_20, %c0_21], %30 {strides = array<i32>} : memref<8x128xf32, #tpu.memory_space<vmem>>, vector<8x128xf32>,
    return
  }
  func.func @transform_0(%arg0: i32) -> (i32, i32) {
    %c0_i32 = arith.constant 0 : i32
    %c0_i32_0 = arith.constant 0 : i32
    return %arg0, %c0_i32 : i32, i32
  }
  func.func @transform_1(%arg0: i32) -> (i32, i32) {
    %c0_i32 = arith.constant 0 : i32
    %c0_i32_0 = arith.constant 0 : i32
    %c0_i32_1 = arith.constant 0 : i32
    return %c0_i32, %c0_i32_0 : i32, i32
  }
  func.func @transform_2(%arg0: i32) -> (i32, i32) {
    %c0_i32 = arith.constant 0 : i32
    %c0_i32_0 = arith.constant 0 : i32
    %c0_i32_1 = arith.constant 0 : i32
    return %c0_i32, %c0_i32_0 : i32, i32
  }
  func.func @transform_3(%arg0: i32) -> (i32, i32) {
    %c0_i32 = arith.constant 0 : i32
    %c0_i32_0 = arith.constant 0 : i32
    %c0_i32_1 = arith.constant 0 : i32
    return %c0_i32, %c0_i32_0 : i32, i32
  }
  func.func @transform_4(%arg0: i32) -> (i32, i32) {
    %c0_i32 = arith.constant 0 : i32
    %c0_i32_0 = arith.constant 0 : i32
    %c0_i32_1 = arith.constant 0 : i32
    return %c0_i32, %c0_i32_0 : i32, i32
  }
  func.func @transform_5(%arg0: i32) -> (i32, i32) {
    %c0_i32 = arith.constant 0 : i32
    %c0_i32_0 = arith.constant 0 : i32
    %c0_i32_1 = arith.constant 0 : i32
    return %c0_i32, %c0_i32_0 : i32, i32
  }
  func.func @transform_6(%arg0: i32) -> (i32, i32) {
    %c0_i32 = arith.constant 0 : i32
    %c0_i32_0 = arith.constant 0 : i32
    %c0_i32_1 = arith.constant 0 : i32
    return %c0_i32, %c0_i32_0 : i32, i32
  }
  func.func @transform_7(%arg0: i32) -> (i32, i32) {
    %c0_i32 = arith.constant 0 : i32
    %c0_i32_0 = arith.constant 0 : i32
    return %arg0, %c0_i32 : i32, i32
  }
}

</mosaic_0001>

<bundles_post_ra>
// kernel: tpu_custom_call.1
= control target key start
LH: loop header
LB: loop body
LE: loop exit
PB: predicated region body
PF: predicated region fallthrough
CT: control target
= control target key end

     0   :  { %12 = vsyncpa [#allocation3], 0  ;;  %s771_s0 = inlined_call_operand.hbm [shape: f32[8,16], index: 0, kind: input, shape index: {}]   ;;  %s772_s1 = inlined_call_operand.hbm [shape: bf16[16,128], index: 1, kind: input, shape index: {}]   ;;  %s773_s2 = inlined_call_operand.vmem [shape: f32[1,128], index: 2, kind: input, shape index: {}]   ;;  %s774_s3 = inlined_call_operand.hbm [shape: bf16[128,128], index: 3, kind: input, shape index: {}]   ;;  %s775_s4 = inlined_call_operand.vmem [shape: f32[1,128], index: 4, kind: input, shape index: {}]   ;;  %s776_s5 = inlined_call_operand.hbm [shape: bf16[128,128], index: 5, kind: input, shape index: {}]   ;;  %s777_s6 = inlined_call_operand.vmem [shape: f32[1,128], index: 6, kind: input, shape index: {}]   ;;  %s778_s7 = inlined_call_operand.hbm [shape: f32[8,128], index: 7, kind: output, shape index: {}]  }
   0x1   :  { %13 = vsyncpa [#allocation6], 0 }
   0x2   :  { %14 = vsyncpa [#allocation9], 0 }
   0x3   :  { %15 = vsyncpa [#allocation4], 0  ;;  %s624_s24 = smov [#allocation5]   ;;  %s506_s28 = scalar_lea.hbm %s772_s1, 128 }
   0x4   :  { %s31_s25 = sshll.u32 %s624_s24, 4  ;;  %p507_p0 = scmp.ne.s32.totalorder %s772_s1, %s506_s28  ;;  %s32_s25 = int_to_ptr.vmem [resolvable:$true] %s31_s25 }
   0x5   :  { %p510_p1 = scmp.lt.u32.totalorder %s506_s28, %s772_s1 }
   0x7   :  { %p512_p2 = pnand %p510_p1, %p507_p0 }
   0x9   :  { %515 = shalt.err (!%p512_p2)
}
   0xa   :  { %s516_s10 = scalar_lea.vmem %s32_s25, 128  ;;  %p521_p4 = scmp.lt.s32.totalorder %s32_s25, %s32_s25 }
   0xb   :  { %p517_p3 = scmp.ne.s32.totalorder %s32_s25, %s516_s10  ;;  %p522_p5 = scmp.lt.s32.totalorder %s516_s10, %s516_s10 }
   0xd   :  { %p523_p6 = por %p522_p5, %p521_p4 }
   0xf   :  { %p524_p7 = pnand %p523_p6, %p517_p3 }
  0x11   :  { %527 = shalt.err (!%p524_p7)
}
  0x12   :  { %s625_s11 = smov 64   ;;  %s626_s12 = smov 4  }
  0x13   :  { %37 = dma.hbm_to_vmem [thread:$0]  %s772_s1, 128, %s32_s25, [#allocation6], %s625_s11, %s625_s11, %s626_s12  }
  0x14   :  { %s627_s15 = smov [#allocation2]   ;;  %s628_s17 = smov [#allocation7]  }
  0x15   :  { %s22_s16 = sshll.u32 %s627_s15, 4  ;;  %s45_s18 = sshll.u32 %s628_s17, 4  ;;  %s23_s16 = int_to_ptr.vmem [resolvable:$true] %s22_s16  ;;  %s46_s18 = int_to_ptr.vmem [resolvable:$true] %s45_s18 }
  0x16   :  { %s528_s21 = scalar_lea.hbm %s771_s0, 128 }
  0x17   :  { %p529_p8 = scmp.ne.s32.totalorder %s771_s0, %s528_s21  ;;  %p532_p9 = scmp.lt.u32.totalorder %s528_s21, %s771_s0 }
  0x19   :  { %p534_p10 = pnand %p532_p9, %p529_p8 }
  0x1b   :  { %537 = shalt.err (!%p534_p10)
}
  0x1c   :  { %s538_s1 = scalar_lea.vmem %s23_s16, 128  ;;  %p543_p12 = scmp.lt.s32.totalorder %s23_s16, %s23_s16 }
  0x1d   :  { %p539_p11 = scmp.ne.s32.totalorder %s23_s16, %s538_s1  ;;  %p544_p13 = scmp.lt.s32.totalorder %s538_s1, %s538_s1 }
  0x1f   :  { %p545_p0 = por %p544_p13, %p543_p12 }
  0x21   :  { %p546_p1 = pnand %p545_p0, %p539_p11 }
  0x23   :  { %549 = shalt.err (!%p546_p1)
}
  0x24   :  { %25 = dma.hbm_to_vmem [thread:$0]  %s771_s0, 128, %s23_s16, [#allocation3]  }
  0x25   :  { %s550_s30 = scalar_lea.hbm %s774_s3, 1024 }
  0x26   :  { %p551_p2 = scmp.ne.s32.totalorder %s774_s3, %s550_s30  ;;  %p554_p3 = scmp.lt.u32.totalorder %s550_s30, %s774_s3 }
  0x28   :  { %p556_p4 = pnand %p554_p3, %p551_p2 }
  0x2a   :  { %559 = shalt.err (!%p556_p4)
}
  0x2b   :  { %s560_s14 = scalar_lea.vmem %s46_s18, 1024  ;;  %p565_p6 = scmp.lt.s32.totalorder %s46_s18, %s46_s18 }
  0x2c   :  { %p561_p5 = scmp.ne.s32.totalorder %s46_s18, %s560_s14  ;;  %p566_p7 = scmp.lt.s32.totalorder %s560_s14, %s560_s14 }
  0x2e   :  { %p567_p8 = por %p566_p7, %p565_p6 }
  0x30   :  { %p568_p9 = pnand %p567_p8, %p561_p5 }
  0x32   :  { %571 = shalt.err (!%p568_p9)
}
  0x33   :  { %51 = dma.hbm_to_vmem [thread:$0]  %s774_s3, 1024, %s46_s18, [#allocation6], %s625_s11, %s625_s11, %s626_s12  }
  0x34   :  { %s629_s16 = smov [#allocation8]   ;;  %s572_s21 = scalar_lea.hbm %s776_s5, 1024 }
  0x35   :  { %s59_s17 = sshll.u32 %s629_s16, 4  ;;  %p573_p10 = scmp.ne.s32.totalorder %s776_s5, %s572_s21  ;;  %s60_s17 = int_to_ptr.vmem [resolvable:$true] %s59_s17 }
  0x36   :  { %p576_p11 = scmp.lt.u32.totalorder %s572_s21, %s776_s5 }
  0x38   :  { %p578_p12 = pnand %p576_p11, %p573_p10 }
  0x3a   :  { %581 = shalt.err (!%p578_p12)
}
  0x3b   :  { %s582_s1 = scalar_lea.vmem %s60_s17, 1024  ;;  %p587_p0 = scmp.lt.s32.totalorder %s60_s17, %s60_s17 }
  0x3c   :  { %p583_p13 = scmp.ne.s32.totalorder %s60_s17, %s582_s1  ;;  %p588_p1 = scmp.lt.s32.totalorder %s582_s1, %s582_s1 }
  0x3e   :  { %p589_p2 = por %p588_p1, %p587_p0 }
  0x40   :  { %p590_p3 = pnand %p589_p2, %p583_p13 }
  0x42   :  { %593 = shalt.err (!%p590_p3)
}
  0x43   :  { %65 = dma.hbm_to_vmem [thread:$0]  %s776_s5, 1024, %s60_s17, [#allocation9], %s625_s11, %s625_s11, %s626_s12  }
  0x44   :  { %616 = dma.done.wait [#allocation3], 128  }
  0x45   :  { %617 = vsyncadd [#allocation3], 4294967168 }
  0x46   :  { %618 = dma.done.wait [#allocation6], 1152  }
  0x47   :  { %619 = vsyncadd [#allocation6], 4294966144 }
  0x48   :  { %620 = dma.done.wait [#allocation9], 1024  }
  0x49   :  { %621 = vsyncadd [#allocation9], 4294966272  ;;  %v630_v0 = vmov 0.0   ;;  %vm631_vm0 = vmmov 0   ;;  %v487_v1 = vld [vmem:[#allocation5] sm:$0xff]   ;;  %v81_v2 = vld [vmem:[#allocation2] sm:$0xff] }
  0x4a   :  { %432 = vmatprep.subr.bf16.mxu0 %v630_v0  ;;  %434 = vmatprep.mubr.msk.bf16.mxu0 %vm631_vm0, %v630_v0  ;;  %v82_v3 = vpack.c.bf16 %v81_v2, %v81_v2  ;;  %vm98_vm1 = vcmask 130048   ;;  %v488_v4 = vld [vmem:[#allocation7] sm:$0xff]   ;;  %v489_v5 = vld [vmem:[#allocation7 + $0x8] sm:$0xff]   ;;  %v490_v6 = vld [vmem:[#allocation7 + $0x10] sm:$0xff]   ;;  %s632_s28 = smov [#allocation10]  }
  0x4b   :  { %438 = vmatprep.subr.bf16.mxu1 %v630_v0  ;;  %454 = vmatprep.mubr.msk.bf16.mxu1 %vm631_vm0, %v630_v0  ;;  %v491_v7 = vld [vmem:[#allocation7 + $0x18] sm:$0xff]   ;;  %v492_v8 = vld [vmem:[#allocation7 + $0x20] sm:$0xff]   ;;  %v493_v9 = vld [vmem:[#allocation7 + $0x28] sm:$0xff]   ;;  %s380_s29 = sshll.u32 %s632_s28, 4  ;;  %s381_s29 = int_to_ptr.vmem [resolvable:$true] %s380_s29 }
  0x4c   :  { %433 = vmatpush3.bf16.msra.mxu0 %v487_v1  ;;  %439 = vmatpush3.bf16.msra.mxu1 %v488_v4  ;;  %v494_v10 = vld [vmem:[#allocation7 + $0x30] sm:$0xff]   ;;  %v495_v11 = vld [vmem:[#allocation7 + $0x38] sm:$0xff]   ;;  %v496_v12 = vld [vmem:[#allocation8] sm:$0xff]   ;;  %p599_p5 = scmp.lt.s32.totalorder %s381_s29, %s381_s29 }
  0x4d   :  { %458 = vmatprep.subr.bf16.mxu0 %v630_v0  ;;  %440 = vmatprep.subr.bf16.mxu1 %v630_v0  ;;  %v497_v13 = vld [vmem:[#allocation8 + $0x8] sm:$0xff]   ;;  %v498_v14 = vld [vmem:[#allocation8 + $0x10] sm:$0xff]   ;;  %v499_v24 = vld [vmem:[#allocation8 + $0x18] sm:$0xff]  }
  0x4e   :  { %v391_v15 = vld [vmem:[%s773_s2] ss:$0 sm:$0xff]  ;;  %v500_v25 = vld [vmem:[#allocation8 + $0x20] sm:$0xff]   ;;  %v501_v26 = vld [vmem:[#allocation8 + $0x28] sm:$0xff]  }
  0x4f   :  { %435 = vmatmul.mubr.msk.bf16.vlgmr.msra.gmra.mrb[0].mxu0 %vm98_vm1, %v82_v3  ;;  %v502_v27 = vld [vmem:[#allocation8 + $0x30] sm:$0xff]   ;;  %v503_v28 = vld [vmem:[#allocation8 + $0x38] sm:$0xff]  }
  0x50   :  { %474 = vmatprep.mubr.msk.bf16.mxu0 %vm631_vm0, %v630_v0  ;;  %441 = vmatpush3.bf16.msra.mxu1 %v489_v5  ;;  %v394_v29 = vld [vmem:[%s775_s4] ss:$0 sm:$0xff]  ;;  %s594_s4 = scalar_lea.vmem %s381_s29, 128 }
  0x51   :  { %442 = vmatprep.subr.bf16.mxu1 %v630_v0  ;;  %459 = vmatpush3.bf16.msra.mxu0 %v496_v12  ;;  %v403_v40 = vld [vmem:[%s777_s6] ss:$0 sm:$0xff]  ;;  %p595_p4 = scmp.ne.s32.totalorder %s381_s29, %s594_s4  ;;  %p600_p6 = scmp.lt.s32.totalorder %s594_s4, %s594_s4 }
  0x52   :  { %460 = vmatprep.subr.bf16.mxu0 %v630_v0 }
  0x53   :  { %p601_p7 = por %p600_p6, %p599_p5 }
  0x54   :  { %443 = vmatpush3.bf16.msra.mxu1 %v490_v6 }
  0x55   :  { %444 = vmatprep.subr.bf16.mxu1 %v630_v0  ;;  %461 = vmatpush3.bf16.msra.mxu0 %v497_v13  ;;  %p602_p8 = pnand %p601_p7, %p595_p4 }
  0x56   :  { %462 = vmatprep.subr.bf16.mxu0 %v630_v0 }
  0x58   :  { %445 = vmatpush3.bf16.msra.mxu1 %v491_v7 }
  0x59   :  { %446 = vmatprep.subr.bf16.mxu1 %v630_v0  ;;  %463 = vmatpush3.bf16.msra.mxu0 %v498_v14 }
  0x5a   :  { %464 = vmatprep.subr.bf16.mxu0 %v630_v0 }
  0x5c   :  { %447 = vmatpush3.bf16.msra.mxu1 %v492_v8 }
  0x5d   :  { %448 = vmatprep.subr.bf16.mxu1 %v630_v0  ;;  %465 = vmatpush3.bf16.msra.mxu0 %v499_v24 }
  0x5e   :  { %466 = vmatprep.subr.bf16.mxu0 %v630_v0 }
  0x60   :  { %449 = vmatpush3.bf16.msra.mxu1 %v493_v9 }
  0x61   :  { %450 = vmatprep.subr.bf16.mxu1 %v630_v0  ;;  %467 = vmatpush3.bf16.msra.mxu0 %v500_v25 }
  0x62   :  { %468 = vmatprep.subr.bf16.mxu0 %v630_v0 }
  0x64   :  { %451 = vmatpush3.bf16.msra.mxu1 %v494_v10 }
  0x65   :  { %452 = vmatprep.subr.bf16.mxu1 %v630_v0  ;;  %469 = vmatpush3.bf16.msra.mxu0 %v501_v26 }
  0x66   :  { %470 = vmatprep.subr.bf16.mxu0 %v630_v0 }
  0x68   :  { %453 = vmatpush3.bf16.msra.mxu1 %v495_v11 }
  0x69   :  { %471 = vmatpush3.bf16.msra.mxu0 %v502_v27 }
  0x6a   :  { %472 = vmatprep.subr.bf16.mxu0 %v630_v0 }
  0x6d   :  { %473 = vmatpush3.bf16.msra.mxu0 %v503_v28 }
 0x122   :  { %v136_v16 = vpop.f32.mrb[0].mxu0 }
 0x123   :  { %v137_v17 = vadd.f32 %v391_v15, %v136_v16  ;;  %v436_v18 = vpop.f32.mrb[1].mxu0 }
 0x124   :  { %v139_v19 = vpop.f32.mrb[2].mxu0 }
 0x125   :  { %vm142_vm2 = vcmp.ge.f32.partialorder %v137_v17, 0.0  ;;  %v143_v20 = vmul.f32 0.01, %v137_v17  ;;  %v437_v21 = vpop.f32.mrb[3].mxu0 }
 0x127   :  { %v144_v22 = vsel %vm142_vm2, %v137_v17, %v143_v20 }
 0x128   :  { %v145_v23 = vpack.c.bf16 %v144_v22, %v144_v22 }
 0x12a   :  { %455 = vmatmul.mubr.bf16.vlgmr.msra.gmra.mrb[0].mxu1 %v145_v23 }
 0x1fd   :  { %v251_v30 = vpop.f32.mrb[0].mxu1 }
 0x1fe   :  { %v252_v31 = vadd.f32 %v394_v29, %v251_v30  ;;  %v456_v32 = vpop.f32.mrb[1].mxu1 }
 0x1ff   :  { %v254_v33 = vpop.f32.mrb[2].mxu1 }
 0x200   :  { %v257_v34 = vmul.f32 0.5, %v252_v31  ;;  %v457_v35 = vpop.f32.mrb[3].mxu1 }
 0x202   :  { %504 = vtanh.f32 %v257_v34 }
 0x20c   :  { %v505_v36 = vpop.eup %504 }
 0x20d   :  { %v259_v37 = vmul.f32 0.5, %v505_v36 }
 0x20f   :  { %v260_v38 = vadd.f32 0.5, %v259_v37 }
 0x211   :  { %v261_v39 = vpack.c.bf16 %v260_v38, %v260_v38 }
 0x213   :  { %475 = vmatmul.mubr.bf16.vlgmr.msra.gmra.mrb[4].mxu0 %v261_v39 }
 0x2e6   :  { %v367_v41 = vpop.f32.mrb[4].mxu0 }
 0x2e7   :  { %v368_v42 = vadd.f32 %v403_v40, %v367_v41  ;;  %v476_v43 = vpop.f32.mrb[5].mxu0 }
 0x2e8   :  { %v370_v44 = vpop.f32.mrb[6].mxu0 }
 0x2e9   :  { %373 = vst [vmem:[#allocation10] sm:$0xff] %v368_v42  ;;  %v477_v45 = vpop.f32.mrb[7].mxu0 }
 0x2ea   :  { %605 = shalt.err (!%p602_p8)
}
 0x2eb   :  { %s606_s6 = scalar_lea.hbm %s778_s7, 128 }
 0x2ec   :  { %p607_p9 = scmp.ne.s32.totalorder %s778_s7, %s606_s6  ;;  %p610_p10 = scmp.lt.u32.totalorder %s606_s6, %s778_s7 }
 0x2ee   :  { %p612_p11 = pnand %p610_p10, %p607_p9 }
 0x2f0   :  { %615 = shalt.err (!%p612_p11)
}
 0x2f1   :  { %383 = dma.vmem_to_hbm [thread:$0]  %s381_s29, 128, %s778_s7, [#allocation4]  }
 0x2f2   :  { %622 = dma.done.wait [#allocation4], 128  }
 0x2f3   :  { %623 = vsyncadd [#allocation4], 4294967168 }
 0x2f4   :  { %387 = vsyncpa [#allocation3], 1 }
 0x2f5   :  { %388 = vsyncpa [#allocation6], 1 }
 0x2f6   :  { %389 = vsyncpa [#allocation9], 1 }
 0x2f7   :  { %390 = vsyncpa [#allocation4], 1 }

</bundles_post_ra>
